<compile_context>
chip_gen: v6e
topology: v6e:2x2x1
jax: 0.10.0
libtpu: 0.0.40
codegen_flags: <defaults>
</compile_context>

<pallas_src>
import jax
import jax.numpy as jnp
from jax.experimental import pallas as pl
from jax.experimental.pallas import tpu as pltpu


def _round_up(a: int, b: int) -> int:
    return (a + b - 1) // b * b


def conv1d_kernel(x_ref, w_ref, b_ref, o_ref):
    # x_ref: (tm, nx)   w_ref: (nx, tn)   b_ref: (1, tn) f32   o_ref: (tm, tn)
    acc = jnp.dot(x_ref[...], w_ref[...], preferred_element_type=jnp.float32)
    o_ref[...] = (acc + b_ref[...]).astype(o_ref.dtype)


def conv1d(x, weight, bias, *, block_m: int = 512, block_n: int = 512,
           compute_dtype=jnp.bfloat16,
           vmem_budget_bytes: int = 40 * 1024 * 1024):
    """Pallas implementation of the PyTorch Conv1D forward.

    x:      (..., nx)
    weight: (nx, nf)   (already (in, out) layout, as in the module)
    bias:   (nf,)
    returns (..., nf) in x.dtype
    """
    *lead, nx = x.shape
    nx_w, nf = weight.shape
    assert nx_w == nx, (nx_w, nx)

    out_dtype = x.dtype
    x2 = x.reshape(-1, nx)
    M = x2.shape[0]

    # --- lane-dense output: pad nf to a multiple of 128 (once, on the host) ---
    nf_pad = _round_up(nf, 128)
    if nf_pad != nf:
        weight = jnp.pad(weight, ((0, 0), (0, nf_pad - nf)))
        bias = jnp.pad(bias, (0, nf_pad - nf))

    in_bytes = jnp.dtype(compute_dtype).itemsize
    out_bytes = jnp.dtype(out_dtype).itemsize
    row_align = 8 * (4 // in_bytes)          # 8 for f32, 16 for bf16, 32 for 8-bit

    # --- row tile: big, dtype-aligned, and >=2 grid steps when M allows ---
    tm = min(block_m, _round_up(M, row_align))
    if M > row_align and pl.cdiv(M, tm) < 2:
        tm = _round_up(pl.cdiv(M, 2), row_align)

    # --- column tile: multiple of 128, shrink to fit the VMEM budget ---
    tn = min(block_n, nf_pad)

    def _vmem_usage(tm_, tn_):
        x_buf = 2 * tm_ * nx * in_bytes                       # double-buffered
        w_bufs = 1 if tn_ == nf_pad else 2
        w_buf = w_bufs * nx * tn_ * in_bytes
        b_buf = w_bufs * tn_ * 4
        o_buf = 2 * tm_ * tn_ * out_bytes
        return x_buf + w_buf + b_buf + o_buf

    while _vmem_usage(tm, tn) > vmem_budget_bytes and tn > 128:
        tn = max(128, tn // 2)
    while _vmem_usage(tm, tn) > vmem_budget_bytes and tm > row_align:
        tm = max(row_align, _round_up(tm // 2, row_align))

    grid_m = pl.cdiv(M, tm)
    grid_n = pl.cdiv(nf_pad, tn)

    # --- cast MXU inputs to bf16 (f32 accumulation in-kernel); bias stays f32 ---
    x2c = x2.astype(compute_dtype)
    wc = weight.astype(compute_dtype)
    b2 = bias.reshape(1, nf_pad).astype(jnp.float32)

    # Grid-invariant weight/bias -> single buffer (only worth it when there is
    # an actual pipeline over M).
    if grid_n == 1 and grid_m > 1:
        w_spec = pl.BlockSpec((nx, tn), lambda n, m: (0, n),
                              pipeline_mode=pl.Buffered(1))
        b_spec = pl.BlockSpec((1, tn), lambda n, m: (0, n),
                              pipeline_mode=pl.Buffered(1))
    else:
        w_spec = pl.BlockSpec((nx, tn), lambda n, m: (0, n))
        b_spec = pl.BlockSpec((1, tn), lambda n, m: (0, n))

    out = pl.pallas_call(
        conv1d_kernel,
        out_shape=jax.ShapeDtypeStruct((M, nf_pad), out_dtype),
        grid=(grid_n, grid_m),                 # n outer, m inner: weight reuse
        in_specs=[
            pl.BlockSpec((tm, nx), lambda n, m: (m, 0)),
            w_spec,
            b_spec,
        ],
        out_specs=pl.BlockSpec((tm, tn), lambda n, m: (m, n)),
        compiler_params=pltpu.CompilerParams(
            dimension_semantics=("parallel", "parallel"),
            vmem_limit_bytes=48 * 1024 * 1024,
        ),
        cost_estimate=pl.CostEstimate(
            flops=2 * M * nx * nf_pad,
            bytes_accessed=(M * nx * in_bytes + nx * nf_pad * in_bytes
                            + nf_pad * 4 + M * nf_pad * out_bytes),
            transcendentals=0,
        ),
    )(x2c, wc, b2)

    if nf_pad != nf:
        out = out[:, :nf]
    return out.reshape(*lead, nf)


def reference_conv1d(x, weight, bias):
    """Pure-JAX reference mirroring torch.addmm(bias, x.view(-1, nx), weight)."""
    *lead, nx = x.shape
    nf = weight.shape[-1]
    y = x.reshape(-1, nx) @ weight + bias
    return y.reshape(*lead, nf)


if __name__ == "__main__":
    key = jax.random.PRNGKey(0)
    k_x, k_w, k_b = jax.random.split(key, 3)

    # Small shapes consistent with the module's usage: (batch, seq, hidden).
    B, S, NX, NF = 2, 8, 32, 32

    x = jax.random.normal(k_x, (B, S, NX), jnp.float32)
    weight = 0.02 * jax.random.normal(k_w, (NX, NF), jnp.float32)   # (nx, nf)
    bias = 0.02 * jax.random.normal(k_b, (NF,), jnp.float32)

    out = conv1d(x, weight, bias)
    out = jax.block_until_ready(out)

    ref = reference_conv1d(x, weight, bias)
    assert out.shape == (B, S, NF), out.shape
    # bf16 MXU inputs with f32 accumulation -> relaxed (but tight for these
    # scales) tolerance vs. the f32 reference.
    assert jnp.allclose(out, ref, atol=2e-2, rtol=2e-2), (
        f"max abs err {float(jnp.max(jnp.abs(out - ref)))}"
    )

    print("KERNEL_OK")
</pallas_src>

<mosaic_0001>
module attributes {stable_mosaic.version = 11 : i64} {
  func.func @conv1d_kernel(%arg0: i32, %arg1: i32, %arg2: memref<16x32xbf16, #tpu.memory_space<vmem>>, %arg3: memref<32x128xbf16, #tpu.memory_space<vmem>>, %arg4: memref<1x128xf32, #tpu.memory_space<vmem>>, %arg5: memref<16x128xf32, #tpu.memory_space<vmem>>) attributes {dimension_semantics = [#tpu.dimension_semantics<parallel>, #tpu.dimension_semantics<parallel>], iteration_bounds = array<i64: 1, 1>, scalar_prefetch = 0 : i64, scratch_operands = 0 : i64, tpu.core_type = #tpu.core_type<tc>, window_params = [{transform_indices = @transform_0, window_bounds = array<i64: 16, 32>}, {transform_indices = @transform_1, window_bounds = array<i64: 32, 128>}, {transform_indices = @transform_2, window_bounds = array<i64: 1, 128>}, {transform_indices = @transform_3, window_bounds = array<i64: 16, 128>}]} {
    %c0 = arith.constant 0 : index
    %c0_0 = arith.constant 0 : index
    %0 = vector.load %arg2[%c0, %c0_0] : memref<16x32xbf16, #tpu.memory_space<vmem>>, vector<16x32xbf16>
    %c0_1 = arith.constant 0 : index
    %c0_2 = arith.constant 0 : index
    %1 = vector.load %arg3[%c0_1, %c0_2] : memref<32x128xbf16, #tpu.memory_space<vmem>>, vector<32x128xbf16>
    %cst = arith.constant dense<0.000000e+00> : vector<16x128xf32>
    %2 = tpu.matmul %0, %1, %cst {dimension_numbers = #tpu.dot_dimension_numbers<[1], [0], [0], [1], [0, 0, 1, 1], [], []>} : vector<16x32xbf16>, vector<32x128xbf16>, vector<16x128xf32> -> vector<16x128xf32>
    %c0_3 = arith.constant 0 : index
    %c0_4 = arith.constant 0 : index
    %3 = vector.load %arg4[%c0_3, %c0_4] : memref<1x128xf32, #tpu.memory_space<vmem>>, vector<1x128xf32>
    %4 = vector.broadcast %3 : vector<1x128xf32> to vector<16x128xf32>
    %5 = arith.addf %2, %4 : vector<16x128xf32>
    %c0_5 = arith.constant 0 : index
    %c0_6 = arith.constant 0 : index
    %6 = vector.load %arg5[%c0_5, %c0_6] : memref<16x128xf32, #tpu.memory_space<vmem>>, vector<16x128xf32>
    tpu.vector_store %arg5[%c0_5, %c0_6], %5 {strides = array<i32>} : memref<16x128xf32, #tpu.memory_space<vmem>>, vector<16x128xf32>,
    return
  }
  func.func @transform_0(%arg0: i32, %arg1: i32) -> (i32, i32) {
    %c0_i32 = arith.constant 0 : i32
    %c0_i32_0 = arith.constant 0 : i32
    return %arg1, %c0_i32 : i32, i32
  }
  func.func @transform_1(%arg0: i32, %arg1: i32) -> (i32, i32) {
    %c0_i32 = arith.constant 0 : i32
    %c0_i32_0 = arith.constant 0 : i32
    return %c0_i32, %arg0 : i32, i32
  }
  func.func @transform_2(%arg0: i32, %arg1: i32) -> (i32, i32) {
    %c0_i32 = arith.constant 0 : i32
    %c0_i32_0 = arith.constant 0 : i32
    return %c0_i32, %arg0 : i32, i32
  }
  func.func @transform_3(%arg0: i32, %arg1: i32) -> (i32, i32) {
    %c0_i32 = arith.constant 0 : i32
    return %arg1, %arg0 : i32, i32
  }
}

</mosaic_0001>

<bundles_post_ra>
// kernel: tpu_custom_call.1
= control target key start
LH: loop header
LB: loop body
LE: loop exit
PB: predicated region body
PF: predicated region fallthrough
CT: control target
= control target key end

     0   :  { %8 = vsyncpa [#allocation3], 0  ;;  %s274_s0 = inlined_call_operand.hbm [shape: bf16[16,32], index: 0, kind: input, shape index: {}]   ;;  %s275_s1 = inlined_call_operand.hbm [shape: bf16[32,128], index: 1, kind: input, shape index: {}]   ;;  %s276_s2 = inlined_call_operand.vmem [shape: f32[1,128], index: 2, kind: input, shape index: {}]   ;;  %s277_s3 = inlined_call_operand.hbm [shape: f32[16,128], index: 3, kind: output, shape index: {}]  }
   0x1   :  { %9 = vsyncpa [#allocation6], 0 }
   0x2   :  { %10 = vsyncpa [#allocation4], 0  ;;  %s233_s12 = smov [#allocation2]  }
   0x3   :  { %s16_s13 = sshll.u32 %s233_s12, 4  ;;  %s17_s13 = int_to_ptr.vmem [resolvable:$true] %s16_s13 }
   0x4   :  { %s175_s14 = scalar_lea.vmem %s17_s13, 128  ;;  %p180_p1 = scmp.lt.s32.totalorder %s17_s13, %s17_s13 }
   0x5   :  { %p176_p0 = scmp.ne.s32.totalorder %s17_s13, %s175_s14  ;;  %p181_p2 = scmp.lt.s32.totalorder %s175_s14, %s175_s14 }
   0x7   :  { %p182_p3 = por %p181_p2, %p180_p1 }
   0x9   :  { %p183_p4 = pnand %p182_p3, %p176_p0 }
   0xb   :  { %186 = shalt.err (!%p183_p4)
}
   0xc   :  { %s234_s15 = smov 64   ;;  %s235_s16 = smov 4  }
   0xd   :  { %22 = dma.hbm_to_vmem [thread:$0]  %s274_s0, 128, %s17_s13, [#allocation3], %s234_s15, %s234_s15, %s235_s16  }
   0xe   :  { %s236_s19 = smov [#allocation5]  }
   0xf   :  { %s28_s20 = sshll.u32 %s236_s19, 4  ;;  %s29_s20 = int_to_ptr.vmem [resolvable:$true] %s28_s20 }
  0x10   :  { %s195_s21 = scalar_lea.vmem %s29_s20, 256  ;;  %p200_p6 = scmp.lt.s32.totalorder %s29_s20, %s29_s20 }
  0x11   :  { %p196_p5 = scmp.ne.s32.totalorder %s29_s20, %s195_s21  ;;  %p201_p7 = scmp.lt.s32.totalorder %s195_s21, %s195_s21 }
  0x13   :  { %p202_p8 = por %p201_p7, %p200_p6 }
  0x15   :  { %p203_p9 = pnand %p202_p8, %p196_p5 }
  0x17   :  { %206 = shalt.err (!%p203_p9)
}
  0x18   :  { %34 = dma.hbm_to_vmem [thread:$0]  %s275_s1, 256, %s29_s20, [#allocation6], %s234_s15, %s234_s15, %s235_s16  }
  0x19   :  { %227 = dma.done.wait [#allocation3], 128  }
  0x1a   :  { %228 = vsyncadd [#allocation3], 4294967168 }
  0x1b   :  { %229 = dma.done.wait [#allocation6], 256  }
  0x1c   :  { %230 = vsyncadd [#allocation6], 4294967040  ;;  %v237_v0 = vmov 0.0   ;;  %vm238_vm0 = vmmov 0   ;;  %v164_v1 = vld [vmem:[#allocation5 + $0x8] sm:$0xff]   ;;  %v165_v2 = vld [vmem:[#allocation5] sm:$0xff]  }
  0x1d   :  { %147 = vmatprep.subr.bf16.mxu0 %v237_v0  ;;  %151 = vmatprep.mubr.msk.bf16.mxu0 %vm238_vm0, %v237_v0  ;;  %v166_v3 = vld [vmem:[#allocation2] sm:$0xff]   ;;  %vm74_vm1 = vcmask 261120   ;;  %s239_s1 = smov [#allocation7]  }
  0x1e   :  { %148 = vmatpush3.bf16.msra.mxu0 %v164_v1  ;;  %v139_v4 = vld [vmem:[%s276_s2] ss:$0 sm:$0xff]  ;;  %s126_s25 = sshll.u32 %s239_s1, 4  ;;  %s127_s25 = int_to_ptr.vmem [resolvable:$true] %s126_s25 }
  0x1f   :  { %149 = vmatprep.subr.bf16.mxu0 %v237_v0  ;;  %s207_s26 = scalar_lea.vmem %s127_s25, 256  ;;  %p212_p11 = scmp.lt.s32.totalorder %s127_s25, %s127_s25 }
  0x20   :  { %p208_p10 = scmp.ne.s32.totalorder %s127_s25, %s207_s26  ;;  %p213_p12 = scmp.lt.s32.totalorder %s207_s26, %s207_s26 }
  0x22   :  { %150 = vmatpush3.bf16.msra.mxu0 %v165_v2  ;;  %p214_p13 = por %p213_p12, %p212_p11 }
  0x24   :  { %p215_p0 = pnand %p214_p13, %p208_p10 }
  0x25   :  { %152 = vmatmul.mubr.msk.bf16.vlgmr.msra.gmra.mxu0 %vm74_vm1, %v166_v3 }
  0xe5   :  { %v112_v5 = vpop.f32.mrf.mxu0 }
  0xe6   :  { %v113_v6 = vadd.f32 %v139_v4, %v112_v5 }
  0xe7   :  { %v153_v7 = vpop.f32.mrf.mxu0 }
  0xe8   :  { %119 = vst [vmem:[#allocation7] sm:$0xff] %v113_v6 }
  0xe9   :  { %v115_v8 = vpop.f32.mrf.mxu0 }
  0xea   :  { %v116_v9 = vadd.f32 %v139_v4, %v115_v8 }
  0xeb   :  { %v154_v10 = vpop.f32.mrf.mxu0 }
  0xec   :  { %120 = vst [vmem:[#allocation7 + $0x8] sm:$0xff] %v116_v9 }
  0xed   :  { %218 = shalt.err (!%p215_p0)
}
  0xee   :  { %s240_s27 = smov 128   ;;  %s241_s2 = smov 8  }
  0xef   :  { %132 = dma.vmem_to_hbm [thread:$0]  %s127_s25, 256, %s277_s3, [#allocation4], %s240_s27, %s240_s27, %s241_s2  }
  0xf0   :  { %231 = dma.done.wait [#allocation4], 256  }
  0xf1   :  { %232 = vsyncadd [#allocation4], 4294967040 }
  0xf2   :  { %136 = vsyncpa [#allocation3], 1 }
  0xf3   :  { %137 = vsyncpa [#allocation6], 1 }
  0xf4   :  { %138 = vsyncpa [#allocation4], 1 }

</bundles_post_ra>
